<compile_context>
chip_gen: v5e
topology: v5e:2x2
jax: 0.10.0
libtpu: 0.0.40
codegen_flags: <defaults>
</compile_context>

<pallas_src>
import jax
import jax.numpy as jnp
from jax.experimental import pallas as pl
from jax.experimental.pallas import tpu as pltpu

HIDDEN = 256


def _critic_kernel(sa_ref, w1_ref, b1_ref, w2a_ref, b2a_ref,
                   w2b_ref, b2b_ref, w3_ref, b3_ref, q_ref):
    """One batch tile: both Q heads, fused layer 1, lane-dense (tile_b, 2) out."""
    H = w2a_ref.shape[0]

    sa = sa_ref[...]                                    # (tile_b, K_pad) bf16

    # ---- Layer 1: both heads fused along N (= 2H), single MXU dot ----------
    h12 = jnp.dot(sa, w1_ref[...], preferred_element_type=jnp.float32) + b1_ref[...]
    h12 = jnp.maximum(h12, 0.0)                         # (tile_b, 2H) f32

    h1 = h12[:, :H].astype(jnp.bfloat16)                # head-1 activations
    h2 = h12[:, H:].astype(jnp.bfloat16)                # head-2 activations

    # ---- Layer 2: one 256x256 MXU pass per head, f32 accumulate ------------
    g1 = jnp.maximum(
        jnp.dot(h1, w2a_ref[...], preferred_element_type=jnp.float32) + b2a_ref[...],
        0.0)
    g2 = jnp.maximum(
        jnp.dot(h2, w2b_ref[...], preferred_element_type=jnp.float32) + b2b_ref[...],
        0.0)

    # ---- Layer 3: single dot of [g1|g2] vs block-diag (2H, 2) weight -------
    g = jnp.concatenate([g1, g2], axis=1).astype(jnp.bfloat16)   # (tile_b, 2H)
    q_ref[...] = (jnp.dot(g, w3_ref[...], preferred_element_type=jnp.float32)
                  + b3_ref[...])                                  # (tile_b, 2)


def pack_critic_params(params, state_dim, action_dim, *, hidden=HIDDEN):
    """Pack per-head (in, out) f32 params into the fused kernel layout."""
    p1, p2 = params["q1"], params["q2"]
    d = state_dim + action_dim
    k_pad = max(128, pl.cdiv(d, 128) * 128)

    # Layer 1: both heads side by side, zero-padded K rows (no effect on dot).
    w1 = jnp.concatenate([p1["w1"], p2["w1"]], axis=1)            # (D, 2H)
    w1 = jnp.pad(w1, ((0, k_pad - d), (0, 0)))                    # (K_pad, 2H)

    # Layer 3: block-diagonal [[w3_q1, 0], [0, w3_q2]] -> (2H, 2).
    zero = jnp.zeros((hidden, 1), jnp.float32)
    w3 = jnp.concatenate(
        [jnp.concatenate([p1["w3"], zero], axis=1),
         jnp.concatenate([zero, p2["w3"]], axis=1)], axis=0)      # (2H, 2)

    return {
        "w1": w1.astype(jnp.bfloat16),                            # (K_pad, 2H)
        "b1": jnp.concatenate([p1["b1"], p2["b1"]], axis=1),      # (1, 2H) f32
        "w2a": p1["w2"].astype(jnp.bfloat16),                     # (H, H)
        "b2a": p1["b2"],                                          # (1, H) f32
        "w2b": p2["w2"].astype(jnp.bfloat16),                     # (H, H)
        "b2b": p2["b2"],                                          # (1, H) f32
        "w3": w3.astype(jnp.bfloat16),                            # (2H, 2)
        "b3": jnp.concatenate([p1["b3"], p2["b3"]], axis=1),      # (1, 2) f32
    }


def critic_forward(state, action, packed, *, tile_b_max=512):
    """Pallas equivalent of Critic.forward: returns (q1, q2), each (B, 1) f32."""
    B = state.shape[0]
    d = state.shape[1] + action.shape[1]
    k_pad, two_h = packed["w1"].shape
    hidden = two_h // 2

    # Batch tiling: >= 2 grid steps whenever the batch allows (v7x has two
    # TensorCores and the batch axis is "parallel"); otherwise the largest
    # tile that covers the batch (per-step overhead dominates compute here).
    b_base = max(16, pl.cdiv(B, 16) * 16)
    n_steps = pl.cdiv(b_base, tile_b_max)
    if n_steps == 1 and b_base >= 32:
        n_steps = 2
    tile_b = pl.cdiv(pl.cdiv(b_base, n_steps), 16) * 16
    b_pad = n_steps * tile_b

    # Single lane-dense bf16 input slab: [state | action | zeros] (b_pad, K_pad).
    sa = jnp.concatenate([state, action], axis=1).astype(jnp.bfloat16)
    sa = jnp.pad(sa, ((0, b_pad - B), (0, k_pad - d)))

    def wspec(arr):  # weights/biases: whole array, resident across grid steps
        return pl.BlockSpec(arr.shape, lambda i: (0, 0))

    weight_bytes = sum(int(v.size) * v.dtype.itemsize for v in packed.values())
    cost = pl.CostEstimate(
        flops=2 * b_pad * (k_pad * two_h + 2 * hidden * hidden + 2 * two_h),
        transcendentals=0,
        bytes_accessed=int(sa.size) * sa.dtype.itemsize + b_pad * 2 * 4 + weight_bytes,
    )

    q = pl.pallas_call(
        _critic_kernel,
        out_shape=jax.ShapeDtypeStruct((b_pad, 2), jnp.float32),
        grid=(n_steps,),
        in_specs=[
            pl.BlockSpec((tile_b, k_pad), lambda i: (i, 0)),
            wspec(packed["w1"]), wspec(packed["b1"]),
            wspec(packed["w2a"]), wspec(packed["b2a"]),
            wspec(packed["w2b"]), wspec(packed["b2b"]),
            wspec(packed["w3"]), wspec(packed["b3"]),
        ],
        out_specs=pl.BlockSpec((tile_b, 2), lambda i: (i, 0)),
        compiler_params=pltpu.CompilerParams(
            dimension_semantics=("parallel",)),
        cost_estimate=cost,
    )(sa,
      packed["w1"], packed["b1"],
      packed["w2a"], packed["b2a"], packed["w2b"], packed["b2b"],
      packed["w3"], packed["b3"])

    q = q[:B]                      # drop zero-padded rows (bias-only Q values)
    return q[:, 0:1], q[:, 1:2]


def init_critic_params(key, state_dim, action_dim, hidden=HIDDEN):
    """Deterministic synthetic init (PyTorch-Linear-like fan_in uniform).

    Weights are stored transposed relative to nn.Linear: shape (in, out).
    Biases are stored as (1, out).
    """
    d = state_dim + action_dim

    def linear(k, fan_in, fan_out):
        kw, kb = jax.random.split(k)
        bound = 1.0 / jnp.sqrt(fan_in)
        w = jax.random.uniform(kw, (fan_in, fan_out), jnp.float32, -bound, bound)
        b = jax.random.uniform(kb, (1, fan_out), jnp.float32, -bound, bound)
        return w, b

    keys = jax.random.split(key, 6)

    def head(k1, k2, k3):
        w1, b1 = linear(k1, d, hidden)
        w2, b2 = linear(k2, hidden, hidden)
        w3, b3 = linear(k3, hidden, 1)
        return {"w1": w1, "b1": b1, "w2": w2, "b2": b2, "w3": w3, "b3": b3}

    return {"q1": head(keys[0], keys[1], keys[2]),
            "q2": head(keys[3], keys[4], keys[5])}


def _reference_forward(state, action, params):
    """Pure-JAX f32 reference matching the PyTorch module semantics."""
    sa = jnp.concatenate([state, action], axis=1)

    def mlp(p):
        h = jnp.maximum(sa @ p["w1"] + p["b1"], 0.0)
        h = jnp.maximum(h @ p["w2"] + p["b2"], 0.0)
        return h @ p["w3"] + p["b3"]

    return mlp(params["q1"]), mlp(params["q2"])


if __name__ == "__main__":
    key = jax.random.PRNGKey(0)
    k_params, k_state, k_action = jax.random.split(key, 3)

    batch, state_dim, action_dim = 2, 8, 4
    params = init_critic_params(k_params, state_dim, action_dim)
    packed = pack_critic_params(params, state_dim, action_dim)

    state = jax.random.normal(k_state, (batch, state_dim), jnp.float32)
    action = jax.random.normal(k_action, (batch, action_dim), jnp.float32)

    q1, q2 = critic_forward(state, action, packed)
    jax.block_until_ready((q1, q2))

    r1, r2 = _reference_forward(state, action, params)
    assert q1.shape == (batch, 1) and q2.shape == (batch, 1)
    # bf16 matmul operands (f32 accumulate) -> loosened tolerance vs f32 ref.
    assert jnp.allclose(q1, r1, atol=5e-2, rtol=5e-2)
    assert jnp.allclose(q2, r2, atol=5e-2, rtol=5e-2)

    print("KERNEL_OK")
</pallas_src>

<mosaic_0001>
module attributes {stable_mosaic.version = 11 : i64} {
  func.func @_critic_kernel(%arg0: i32, %arg1: memref<16x128xbf16, #tpu.memory_space<vmem>>, %arg2: memref<128x512xbf16, #tpu.memory_space<vmem>>, %arg3: memref<1x512xf32, #tpu.memory_space<vmem>>, %arg4: memref<256x256xbf16, #tpu.memory_space<vmem>>, %arg5: memref<1x256xf32, #tpu.memory_space<vmem>>, %arg6: memref<256x256xbf16, #tpu.memory_space<vmem>>, %arg7: memref<1x256xf32, #tpu.memory_space<vmem>>, %arg8: memref<512x2xbf16, #tpu.memory_space<vmem>>, %arg9: memref<1x2xf32, #tpu.memory_space<vmem>>, %arg10: memref<16x2xf32, #tpu.memory_space<vmem>>) attributes {dimension_semantics = [#tpu.dimension_semantics<parallel>], iteration_bounds = array<i64: 1>, scalar_prefetch = 0 : i64, scratch_operands = 0 : i64, tpu.core_type = #tpu.core_type<tc>, window_params = [{transform_indices = @transform_0, window_bounds = array<i64: 16, 128>}, {pipeline_mode = #tpu.pipeline_mode<synchronous>, transform_indices = @transform_1, window_bounds = array<i64: 128, 512>}, {pipeline_mode = #tpu.pipeline_mode<synchronous>, transform_indices = @transform_2, window_bounds = array<i64: 1, 512>}, {pipeline_mode = #tpu.pipeline_mode<synchronous>, transform_indices = @transform_3, window_bounds = array<i64: 256, 256>}, {pipeline_mode = #tpu.pipeline_mode<synchronous>, transform_indices = @transform_4, window_bounds = array<i64: 1, 256>}, {pipeline_mode = #tpu.pipeline_mode<synchronous>, transform_indices = @transform_5, window_bounds = array<i64: 256, 256>}, {pipeline_mode = #tpu.pipeline_mode<synchronous>, transform_indices = @transform_6, window_bounds = array<i64: 1, 256>}, {pipeline_mode = #tpu.pipeline_mode<synchronous>, transform_indices = @transform_7, window_bounds = array<i64: 512, 2>}, {pipeline_mode = #tpu.pipeline_mode<synchronous>, transform_indices = @transform_8, window_bounds = array<i64: 1, 2>}, {transform_indices = @transform_9, window_bounds = array<i64: 16, 2>}]} {
    %c0 = arith.constant 0 : index
    %c0_0 = arith.constant 0 : index
    %0 = vector.load %arg1[%c0, %c0_0] : memref<16x128xbf16, #tpu.memory_space<vmem>>, vector<16x128xbf16>
    %c0_1 = arith.constant 0 : index
    %c0_2 = arith.constant 0 : index
    %1 = vector.load %arg2[%c0_1, %c0_2] : memref<128x512xbf16, #tpu.memory_space<vmem>>, vector<128x512xbf16>
    %cst = arith.constant dense<0.000000e+00> : vector<16x512xf32>
    %2 = tpu.matmul %0, %1, %cst {dimension_numbers = #tpu.dot_dimension_numbers<[1], [0], [0], [1], [0, 0, 1, 1], [], []>} : vector<16x128xbf16>, vector<128x512xbf16>, vector<16x512xf32> -> vector<16x512xf32>
    %c0_3 = arith.constant 0 : index
    %c0_4 = arith.constant 0 : index
    %3 = vector.load %arg3[%c0_3, %c0_4] : memref<1x512xf32, #tpu.memory_space<vmem>>, vector<1x512xf32>
    %4 = vector.broadcast %3 : vector<1x512xf32> to vector<16x512xf32>
    %5 = arith.addf %2, %4 : vector<16x512xf32>
    %cst_5 = arith.constant 0.000000e+00 : f32
    %6 = vector.broadcast %cst_5 : f32 to vector<16x512xf32>
    %7 = arith.maximumf %5, %6 : vector<16x512xf32>
    %8 = vector.extract_strided_slice %7 {offsets = [0, 0], sizes = [16, 256], strides = [1, 1]} : vector<16x512xf32> to vector<16x256xf32>
    %9 = arith.truncf %8 : vector<16x256xf32> to vector<16x256xbf16>
    %10 = vector.extract_strided_slice %7 {offsets = [0, 256], sizes = [16, 256], strides = [1, 1]} : vector<16x512xf32> to vector<16x256xf32>
    %11 = arith.truncf %10 : vector<16x256xf32> to vector<16x256xbf16>
    %c0_6 = arith.constant 0 : index
    %c0_7 = arith.constant 0 : index
    %12 = vector.load %arg4[%c0_6, %c0_7] : memref<256x256xbf16, #tpu.memory_space<vmem>>, vector<256x256xbf16>
    %cst_8 = arith.constant dense<0.000000e+00> : vector<16x256xf32>
    %13 = tpu.matmul %9, %12, %cst_8 {dimension_numbers = #tpu.dot_dimension_numbers<[1], [0], [0], [1], [0, 0, 1, 1], [], []>} : vector<16x256xbf16>, vector<256x256xbf16>, vector<16x256xf32> -> vector<16x256xf32>
    %c0_9 = arith.constant 0 : index
    %c0_10 = arith.constant 0 : index
    %14 = vector.load %arg5[%c0_9, %c0_10] : memref<1x256xf32, #tpu.memory_space<vmem>>, vector<1x256xf32>
    %15 = vector.broadcast %14 : vector<1x256xf32> to vector<16x256xf32>
    %16 = arith.addf %13, %15 : vector<16x256xf32>
    %cst_11 = arith.constant 0.000000e+00 : f32
    %17 = vector.broadcast %cst_11 : f32 to vector<16x256xf32>
    %18 = arith.maximumf %16, %17 : vector<16x256xf32>
    %c0_12 = arith.constant 0 : index
    %c0_13 = arith.constant 0 : index
    %19 = vector.load %arg6[%c0_12, %c0_13] : memref<256x256xbf16, #tpu.memory_space<vmem>>, vector<256x256xbf16>
    %cst_14 = arith.constant dense<0.000000e+00> : vector<16x256xf32>
    %20 = tpu.matmul %11, %19, %cst_14 {dimension_numbers = #tpu.dot_dimension_numbers<[1], [0], [0], [1], [0, 0, 1, 1], [], []>} : vector<16x256xbf16>, vector<256x256xbf16>, vector<16x256xf32> -> vector<16x256xf32>
    %c0_15 = arith.constant 0 : index
    %c0_16 = arith.constant 0 : index
    %21 = vector.load %arg7[%c0_15, %c0_16] : memref<1x256xf32, #tpu.memory_space<vmem>>, vector<1x256xf32>
    %22 = vector.broadcast %21 : vector<1x256xf32> to vector<16x256xf32>
    %23 = arith.addf %20, %22 : vector<16x256xf32>
    %cst_17 = arith.constant 0.000000e+00 : f32
    %24 = vector.broadcast %cst_17 : f32 to vector<16x256xf32>
    %25 = arith.maximumf %23, %24 : vector<16x256xf32>
    %26 = tpu.concatenate %18, %25 in 1 : vector<16x256xf32>, vector<16x256xf32> -> vector<16x512xf32>
    %27 = arith.truncf %26 : vector<16x512xf32> to vector<16x512xbf16>
    %c0_18 = arith.constant 0 : index
    %c0_19 = arith.constant 0 : index
    %28 = vector.load %arg8[%c0_18, %c0_19] : memref<512x2xbf16, #tpu.memory_space<vmem>>, vector<512x2xbf16>
    %cst_20 = arith.constant dense<0.000000e+00> : vector<16x2xf32>
    %29 = tpu.matmul %27, %28, %cst_20 {dimension_numbers = #tpu.dot_dimension_numbers<[1], [0], [0], [1], [0, 0, 1, 1], [], []>} : vector<16x512xbf16>, vector<512x2xbf16>, vector<16x2xf32> -> vector<16x2xf32>
    %c0_21 = arith.constant 0 : index
    %c0_22 = arith.constant 0 : index
    %30 = vector.load %arg9[%c0_21, %c0_22] : memref<1x2xf32, #tpu.memory_space<vmem>>, vector<1x2xf32>
    %31 = vector.broadcast %30 : vector<1x2xf32> to vector<16x2xf32>
    %32 = arith.addf %29, %31 : vector<16x2xf32>
    %c0_23 = arith.constant 0 : index
    %c0_24 = arith.constant 0 : index
    %33 = vector.load %arg10[%c0_23, %c0_24] : memref<16x2xf32, #tpu.memory_space<vmem>>, vector<16x2xf32>
    tpu.vector_store %arg10[%c0_23, %c0_24], %32 {strides = array<i32>} : memref<16x2xf32, #tpu.memory_space<vmem>>, vector<16x2xf32>,
    return
  }
  func.func @transform_0(%arg0: i32) -> (i32, i32) {
    %c0_i32 = arith.constant 0 : i32
    %c0_i32_0 = arith.constant 0 : i32
    return %arg0, %c0_i32 : i32, i32
  }
  func.func @transform_1(%arg0: i32) -> (i32, i32) {
    %c0_i32 = arith.constant 0 : i32
    %c0_i32_0 = arith.constant 0 : i32
    %c0_i32_1 = arith.constant 0 : i32
    return %c0_i32, %c0_i32_0 : i32, i32
  }
  func.func @transform_2(%arg0: i32) -> (i32, i32) {
    %c0_i32 = arith.constant 0 : i32
    %c0_i32_0 = arith.constant 0 : i32
    %c0_i32_1 = arith.constant 0 : i32
    return %c0_i32, %c0_i32_0 : i32, i32
  }
  func.func @transform_3(%arg0: i32) -> (i32, i32) {
    %c0_i32 = arith.constant 0 : i32
    %c0_i32_0 = arith.constant 0 : i32
    %c0_i32_1 = arith.constant 0 : i32
    return %c0_i32, %c0_i32_0 : i32, i32
  }
  func.func @transform_4(%arg0: i32) -> (i32, i32) {
    %c0_i32 = arith.constant 0 : i32
    %c0_i32_0 = arith.constant 0 : i32
    %c0_i32_1 = arith.constant 0 : i32
    return %c0_i32, %c0_i32_0 : i32, i32
  }
  func.func @transform_5(%arg0: i32) -> (i32, i32) {
    %c0_i32 = arith.constant 0 : i32
    %c0_i32_0 = arith.constant 0 : i32
    %c0_i32_1 = arith.constant 0 : i32
    return %c0_i32, %c0_i32_0 : i32, i32
  }
  func.func @transform_6(%arg0: i32) -> (i32, i32) {
    %c0_i32 = arith.constant 0 : i32
    %c0_i32_0 = arith.constant 0 : i32
    %c0_i32_1 = arith.constant 0 : i32
    return %c0_i32, %c0_i32_0 : i32, i32
  }
  func.func @transform_7(%arg0: i32) -> (i32, i32) {
    %c0_i32 = arith.constant 0 : i32
    %c0_i32_0 = arith.constant 0 : i32
    %c0_i32_1 = arith.constant 0 : i32
    return %c0_i32, %c0_i32_0 : i32, i32
  }
  func.func @transform_8(%arg0: i32) -> (i32, i32) {
    %c0_i32 = arith.constant 0 : i32
    %c0_i32_0 = arith.constant 0 : i32
    %c0_i32_1 = arith.constant 0 : i32
    return %c0_i32, %c0_i32_0 : i32, i32
  }
  func.func @transform_9(%arg0: i32) -> (i32, i32) {
    %c0_i32 = arith.constant 0 : i32
    %c0_i32_0 = arith.constant 0 : i32
    return %arg0, %c0_i32 : i32, i32
  }
}

</mosaic_0001>

<bundles_post_ra>
// kernel: tpu_custom_call.1
= control target key start
LH: loop header
LB: loop body
LE: loop exit
PB: predicated region body
PF: predicated region fallthrough
CT: control target
= control target key end

     0   :  { %14 = vsyncpa [#allocation3], 0  ;;  %s2385_s0 = inlined_call_operand.hbm [shape: bf16[16,128], index: 0, kind: input, shape index: {}]   ;;  %s2386_s1 = inlined_call_operand.vmem [shape: bf16[128,512], index: 1, kind: input, shape index: {}]   ;;  %s2387_s2 = inlined_call_operand.vmem [shape: f32[1,512], index: 2, kind: input, shape index: {}]   ;;  %s2388_s3 = inlined_call_operand.hbm [shape: bf16[256,256], index: 3, kind: input, shape index: {}]   ;;  %s2389_s4 = inlined_call_operand.vmem [shape: f32[1,256], index: 4, kind: input, shape index: {}]   ;;  %s2390_s5 = inlined_call_operand.hbm [shape: bf16[256,256], index: 5, kind: input, shape index: {}]   ;;  %s2391_s6 = inlined_call_operand.hbm [shape: f32[1,256], index: 6, kind: input, shape index: {}]   ;;  %s2392_s7 = inlined_call_operand.vmem [shape: bf16[512,2], index: 7, kind: input, shape index: {}]   ;;  %s2393_s8 = inlined_call_operand.hbm [shape: f32[1,2], index: 8, kind: input, shape index: {}]   ;;  %s2394_s9 = inlined_call_operand.vmem [shape: f32[16,2], index: 9, kind: output, shape index: {}]  }
   0x1   :  { %15 = vsyncpa [#allocation5], 0  ;;  %s38_s11 = sshll.u32 %s2388_s3, 4  ;;  %s39_s11 = int_to_ptr.hbm [resolvable:$true] %s38_s11 }
   0x2   :  { %16 = vsyncpa [#allocation8], 0  ;;  %s2011_s12 = smov [#allocation4]   ;;  %s67_s16 = sshll.u32 %s2391_s6, 4  ;;  %s68_s16 = int_to_ptr.hbm [resolvable:$true] %s67_s16 }
   0x3   :  { %s40_s13 = sshll.u32 %s2011_s12, 4  ;;  %s2012_s17 = smov 128   ;;  %s41_s13 = int_to_ptr.vmem [resolvable:$true] %s40_s13 }
   0x4   :  { %s2013_s18 = smov 8   ;;  %s2014_s19 = smov [#allocation7]  }
   0x5   :  { %46 = dma.hbm_to_vmem [thread:$0]  %s39_s11, 4096, %s41_s13, [#allocation5], %s2012_s17, %s2012_s17, %s2013_s18  }
   0x6   :  { %s69_s20 = sshll.u32 %s2014_s19, 4  ;;  %s21_s23 = sshll.u32 %s2385_s0, 4  ;;  %s70_s20 = int_to_ptr.vmem [resolvable:$true] %s69_s20  ;;  %s22_s23 = int_to_ptr.hbm [resolvable:$true] %s21_s23 }
   0x7   :  { %72 = dma.hbm_to_vmem [thread:$0]  %s68_s16, 32, %s70_s20, [#allocation8]  }
   0x8   :  { %s2015_s3 = smov [#allocation2]   ;;  %s53_s6 = sshll.u32 %s2390_s5, 4  ;;  %s54_s6 = int_to_ptr.hbm [resolvable:$true] %s53_s6 }
   0x9   :  { %s23_s24 = sshll.u32 %s2015_s3, 4  ;;  %s2016_s27 = smov 64   ;;  %s24_s24 = int_to_ptr.vmem [resolvable:$true] %s23_s24 }
   0xa   :  { %s2017_s28 = smov 4   ;;  %s2018_s29 = smov [#allocation6]  }
   0xb   :  { %29 = dma.hbm_to_vmem [thread:$0]  %s22_s23, 128, %s24_s24, [#allocation3], %s2016_s27, %s2016_s27, %s2017_s28  }
   0xc   :  { %s55_s30 = sshll.u32 %s2018_s29, 4  ;;  %s80_s0 = sshll.u32 %s2393_s8, 4  ;;  %s56_s30 = int_to_ptr.vmem [resolvable:$true] %s55_s30  ;;  %s81_s0 = int_to_ptr.hbm [resolvable:$true] %s80_s0 }
   0xd   :  { %61 = dma.hbm_to_vmem [thread:$0]  %s54_s6, 4096, %s56_s30, [#allocation5], %s2012_s17, %s2012_s17, %s2013_s18  }
   0xe   :  { %s2019_s12 = smov [#allocation9]  }
   0xf   :  { %s82_s13 = sshll.u32 %s2019_s12, 4  ;;  %s83_s13 = int_to_ptr.vmem [resolvable:$true] %s82_s13 }
  0x10   :  { %85 = dma.hbm_to_vmem [thread:$0]  %s81_s0, 16, %s83_s13, [#allocation8]  }
  0x11   :  { %2005 = dma.done.wait [#allocation3], 128  }
  0x12   :  { %2006 = vsyncadd [#allocation3], 4294967168 }
  0x13   :  { %2007 = dma.done.wait [#allocation5], 8192  }
  0x14   :  { %2008 = vsyncadd [#allocation5], 4294959104 }
  0x15   :  { %2009 = dma.done.wait [#allocation8], 48  }
  0x16   :  { %2010 = vsyncadd [#allocation8], 4294967248  ;;  %v1348_v0 = vld [vmem:[%s2386_s1 + $0xe0] sm:$0xf]  ;;  %v1777_v1 = vld [vmem:[%s2386_s1 + $0xec] sm:$0xf0] }
  0x17   :  { %v1775_v2 = vld [vmem:[%s2386_s1 + $0xe4] sm:$0xf]  ;;  %v1349_v3 = vor.u32 %v1777_v1, %v1348_v0  ;;  %v1350_v4 = vld [vmem:[%s2386_s1 + $0xf0] sm:$0xf0]  ;;  %v1356_v5 = vld [vmem:[%s2386_s1 + $0xe8] sm:$0xf] }
  0x18   :  { %v1778_v6 = vld [vmem:[%s2386_s1 + $0xf4] sm:$0xf0]  ;;  %v1353_v7 = vor.u32 %v1775_v2, %v1350_v4  ;;  %v1332_v9 = vld [vmem:[%s2386_s1 + $0xc0] sm:$0xf]  ;;  %v1773_v10 = vld [vmem:[%s2386_s1 + $0xcc] sm:$0xf0] }
  0x19   :  { %v1357_v8 = vor.u32 %v1778_v6, %v1356_v5  ;;  %v1771_v11 = vld [vmem:[%s2386_s1 + $0xc4] sm:$0xf]  ;;  %316 = vmatpush.bf16.msra.mxu0 %v1349_v3  ;;  %v1333_v12 = vor.u32 %v1773_v10, %v1332_v9  ;;  %v1334_v13 = vld [vmem:[%s2386_s1 + $0xd0] sm:$0xf0]  ;;  %v1776_v14 = vld [vmem:[%s2386_s1 + $0xec] sm:$0xf] }
  0x1a   :  { %v1358_v15 = vld [vmem:[%s2386_s1 + $0xf8] sm:$0xf0]  ;;  %330 = vmatpush.bf16.msra.mxu1 %v1353_v7  ;;  %v1337_v16 = vor.u32 %v1771_v11, %v1334_v13  ;;  %v1340_v18 = vld [vmem:[%s2386_s1 + $0xc8] sm:$0xf]  ;;  %v1774_v19 = vld [vmem:[%s2386_s1 + $0xd4] sm:$0xf0] }
  0x1b   :  { %344 = vmatpush.bf16.msra.mxu2 %v1357_v8  ;;  %v1361_v17 = vor.u32 %v1776_v14, %v1358_v15  ;;  %v1316_v20 = vld [vmem:[%s2386_s1 + $0xa0] sm:$0xf]  ;;  %v1341_v21 = vor.u32 %v1774_v19, %v1340_v18  ;;  %v1769_v22 = vld [vmem:[%s2386_s1 + $0xac] sm:$0xf0]  ;;  %v1767_v23 = vld [vmem:[%s2386_s1 + $0xa4] sm:$0xf] }
  0x1c   :  { %v1318_v24 = vld [vmem:[%s2386_s1 + $0xb0] sm:$0xf0]  ;;  %v1772_v25 = vld [vmem:[%s2386_s1 + $0xcc] sm:$0xf]  ;;  %v1342_v26 = vld [vmem:[%s2386_s1 + $0xd8] sm:$0xf0]  ;;  %v1317_v28 = vor.u32 %v1769_v22, %v1316_v20 }
  0x1d   :  { %358 = vmatpush.bf16.msra.mxu3 %v1361_v17  ;;  %v1324_v27 = vld [vmem:[%s2386_s1 + $0xa8] sm:$0xf]  ;;  %317 = vmatpush.bf16.msra.mxu0 %v1333_v12  ;;  %v1345_v29 = vor.u32 %v1772_v25, %v1342_v26  ;;  %v1770_v30 = vld [vmem:[%s2386_s1 + $0xb4] sm:$0xf0]  ;;  %v1300_v31 = vld [vmem:[%s2386_s1 + $0x80] sm:$0xf]  ;;  %v1321_v33 = vor.u32 %v1767_v23, %v1318_v24 }
  0x1e   :  { %v1765_v32 = vld [vmem:[%s2386_s1 + $0x8c] sm:$0xf0]  ;;  %331 = vmatpush.bf16.msra.mxu1 %v1337_v16  ;;  %v1325_v34 = vor.u32 %v1770_v30, %v1324_v27  ;;  %v1763_v35 = vld [vmem:[%s2386_s1 + $0x84] sm:$0xf]  ;;  %v1302_v36 = vld [vmem:[%s2386_s1 + $0x90] sm:$0xf0] }
  0x1f   :  { %345 = vmatpush.bf16.msra.mxu2 %v1341_v21  ;;  %v1768_v37 = vld [vmem:[%s2386_s1 + $0xac] sm:$0xf]  ;;  %v1326_v38 = vld [vmem:[%s2386_s1 + $0xb8] sm:$0xf0]  ;;  %v1308_v39 = vld [vmem:[%s2386_s1 + $0x88] sm:$0xf]  ;;  %v1301_v42 = vor.u32 %v1765_v32, %v1300_v31  ;;  %v1305_v45 = vor.u32 %v1763_v35, %v1302_v36 }
  0x20   :  { %v1766_v40 = vld [vmem:[%s2386_s1 + $0x94] sm:$0xf0]  ;;  %v1329_v41 = vor.u32 %v1768_v37, %v1326_v38  ;;  %v1764_v43 = vld [vmem:[%s2386_s1 + $0x8c] sm:$0xf]  ;;  %v1310_v44 = vld [vmem:[%s2386_s1 + $0x98] sm:$0xf0] }
  0x21   :  { %359 = vmatpush.bf16.msra.mxu3 %v1345_v29  ;;  %318 = vmatpush.bf16.msra.mxu0 %v1317_v28  ;;  %v1309_v46 = vor.u32 %v1766_v40, %v1308_v39  ;;  %v1284_v47 = vld [vmem:[%s2386_s1 + $0x60] sm:$0xf]  ;;  %v1761_v48 = vld [vmem:[%s2386_s1 + $0x6c] sm:$0xf0]  ;;  %v1759_v49 = vld [vmem:[%s2386_s1 + $0x64] sm:$0xf]  ;;  %v1313_v53 = vor.u32 %v1764_v43, %v1310_v44 }
  0x22   :  { %332 = vmatpush.bf16.msra.mxu1 %v1321_v33  ;;  %v1286_v50 = vld [vmem:[%s2386_s1 + $0x70] sm:$0xf0]  ;;  %v1292_v51 = vld [vmem:[%s2386_s1 + $0x68] sm:$0xf]  ;;  %v1762_v52 = vld [vmem:[%s2386_s1 + $0x74] sm:$0xf0]  ;;  %v1285_v54 = vor.u32 %v1761_v48, %v1284_v47 }
  0x23   :  { %346 = vmatpush.bf16.msra.mxu2 %v1325_v34  ;;  %v1760_v55 = vld [vmem:[%s2386_s1 + $0x6c] sm:$0xf]  ;;  %v1294_v56 = vld [vmem:[%s2386_s1 + $0x78] sm:$0xf0]  ;;  %v1289_v57 = vor.u32 %v1759_v49, %v1286_v50  ;;  %v1293_v58 = vor.u32 %v1762_v52, %v1292_v51  ;;  %v1268_v59 = vld [vmem:[%s2386_s1 + $0x40] sm:$0xf] }
  0x24   :  { %v1757_v60 = vld [vmem:[%s2386_s1 + $0x4c] sm:$0xf0]  ;;  %v1755_v61 = vld [vmem:[%s2386_s1 + $0x44] sm:$0xf]  ;;  %v1270_v62 = vld [vmem:[%s2386_s1 + $0x50] sm:$0xf0]  ;;  %v1297_v1 = vor.u32 %v1760_v55, %v1294_v56 }
  0x25   :  { %360 = vmatpush.bf16.msra.mxu3 %v1329_v41  ;;  %319 = vmatpush.bf16.msra.mxu0 %v1301_v42  ;;  %v1276_v63 = vld [vmem:[%s2386_s1 + $0x48] sm:$0xf]  ;;  %v1758_v0 = vld [vmem:[%s2386_s1 + $0x54] sm:$0xf0]  ;;  %v1269_v2 = vor.u32 %v1757_v60, %v1268_v59  ;;  %v1756_v3 = vld [vmem:[%s2386_s1 + $0x4c] sm:$0xf]  ;;  %v1273_v5 = vor.u32 %v1755_v61, %v1270_v62 }
  0x26   :  { %333 = vmatpush.bf16.msra.mxu1 %v1305_v45  ;;  %v1278_v4 = vld [vmem:[%s2386_s1 + $0x58] sm:$0xf0]  ;;  %v1277_v6 = vor.u32 %v1758_v0, %v1276_v63  ;;  %v1252_v7 = vld [vmem:[%s2386_s1 + $0x20] sm:$0xf]  ;;  %v1753_v8 = vld [vmem:[%s2386_s1 + $0x2c] sm:$0xf0] }
  0x27   :  { %347 = vmatpush.bf16.msra.mxu2 %v1309_v46  ;;  %v1751_v9 = vld [vmem:[%s2386_s1 + $0x24] sm:$0xf]  ;;  %v1254_v10 = vld [vmem:[%s2386_s1 + $0x30] sm:$0xf0]  ;;  %v1260_v11 = vld [vmem:[%s2386_s1 + $0x28] sm:$0xf]  ;;  %v1281_v13 = vor.u32 %v1756_v3, %v1278_v4  ;;  %v1253_v14 = vor.u32 %v1753_v8, %v1252_v7 }
  0x28   :  { %v1754_v12 = vld [vmem:[%s2386_s1 + $0x34] sm:$0xf0]  ;;  %v1236_v15 = vld [vmem:[%s2386_s1] sm:$0xf]  ;;  %v1752_v16 = vld [vmem:[%s2386_s1 + $0x2c] sm:$0xf]  ;;  %v1257_v18 = vor.u32 %v1751_v9, %v1254_v10 }
  0x29   :  { %361 = vmatpush.bf16.msra.mxu3 %v1313_v53  ;;  %320 = vmatpush.bf16.msra.mxu0 %v1285_v54  ;;  %v1262_v17 = vld [vmem:[%s2386_s1 + $0x38] sm:$0xf0]  ;;  %v1261_v19 = vor.u32 %v1754_v12, %v1260_v11  ;;  %v1749_v20 = vld [vmem:[%s2386_s1 + $0xc] sm:$0xf0]  ;;  %v1747_v21 = vld [vmem:[%s2386_s1 + $0x4] sm:$0xf] }
  0x2a   :  { %334 = vmatpush.bf16.msra.mxu1 %v1289_v57  ;;  %v1238_v22 = vld [vmem:[%s2386_s1 + $0x10] sm:$0xf0]  ;;  %v1244_v23 = vld [vmem:[%s2386_s1 + $0x8] sm:$0xf]  ;;  %v1750_v24 = vld [vmem:[%s2386_s1 + $0x14] sm:$0xf0]  ;;  %v1265_v26 = vor.u32 %v1752_v16, %v1262_v17  ;;  %v1237_v30 = vor.u32 %v1749_v20, %v1236_v15 }
  0x2b   :  { %348 = vmatpush.bf16.msra.mxu2 %v1293_v58  ;;  %v1420_v25 = vld [vmem:[#allocation4 + $0x70] sm:$0xf]  ;;  %v1794_v27 = vld [vmem:[#allocation4 + $0x74] sm:$0xf0]  ;;  %v1748_v31 = vld [vmem:[%s2386_s1 + $0xc] sm:$0xf]  ;;  %v1241_v33 = vor.u32 %v1747_v21, %v1238_v22  ;;  %v1245_v34 = vor.u32 %v1750_v24, %v1244_v23 }
  0x2c   :  { %v1484_v28 = vld [vmem:[#allocation4 + $0xf0] sm:$0xf]  ;;  %v1810_v29 = vld [vmem:[#allocation4 + $0xf4] sm:$0xf0]  ;;  %v1246_v32 = vld [vmem:[%s2386_s1 + $0x18] sm:$0xf0]  ;;  %v1421_v36 = vor.u32 %v1794_v27, %v1420_v25 }
  0x2d   :  { %362 = vmatpush.bf16.msra.mxu3 %v1297_v1  ;;  %321 = vmatpush.bf16.msra.mxu0 %v1269_v2  ;;  %v1793_v35 = vld [vmem:[#allocation4 + $0x74] sm:$0xf]  ;;  %v1485_v37 = vor.u32 %v1810_v29, %v1484_v28  ;;  %v1422_v38 = vld [vmem:[#allocation4 + $0x78] sm:$0xf0]  ;;  %v1249_v42 = vor.u32 %v1748_v31, %v1246_v32  ;;  %v1412_v43 = vld [vmem:[#allocation4 + $0x60] sm:$0xf] }
  0x2e   :  { %335 = vmatpush.bf16.msra.mxu1 %v1273_v5  ;;  %v1809_v39 = vld [vmem:[#allocation4 + $0xf4] sm:$0xf]  ;;  %v1486_v40 = vld [vmem:[#allocation4 + $0xf8] sm:$0xf0]  ;;  %v1792_v44 = vld [vmem:[#allocation4 + $0x64] sm:$0xf0]  ;;  %v1425_v47 = vor.u32 %v1793_v35, %v1422_v38 }
  0x2f   :  { %349 = vmatpush.bf16.msra.mxu2 %v1277_v6  ;;  %v1746_v41 = vld [vmem:[#allocation2] sm:$0xff]  ;;  %v1476_v45 = vld [vmem:[#allocation4 + $0xe0] sm:$0xf]  ;;  %v1808_v46 = vld [vmem:[#allocation4 + $0xe4] sm:$0xf0]  ;;  %v1489_v48 = vor.u32 %v1809_v39, %v1486_v40  ;;  %v1413_v50 = vor.u32 %v1792_v44, %v1412_v43  ;;  %vm1220_vm0 = vcmask 15360  }
  0x30   :  { %v1791_v49 = vld [vmem:[#allocation4 + $0x64] sm:$0xf]  ;;  %v1414_v51 = vld [vmem:[#allocation4 + $0x68] sm:$0xf0]  ;;  %v1477_v54 = vor.u32 %v1808_v46, %v1476_v45  ;;  %v1404_v55 = vld [vmem:[#allocation4 + $0x50] sm:$0xf] }
  0x31   :  { %363 = vmatpush.bf16.msra.mxu3 %v1281_v13  ;;  %322 = vmatpush.bf16.msra.mxu0 %v1253_v14  ;;  %v1807_v52 = vld [vmem:[#allocation4 + $0xe4] sm:$0xf]  ;;  %v1478_v53 = vld [vmem:[#allocation4 + $0xe8] sm:$0xf0]  ;;  %v1790_v56 = vld [vmem:[#allocation4 + $0x54] sm:$0xf0]  ;;  %v1417_v59 = vor.u32 %v1791_v49, %v1414_v51 }
  0x32   :  { %336 = vmatpush.bf16.msra.mxu1 %v1257_v18  ;;  %v1468_v57 = vld [vmem:[#allocation4 + $0xd0] sm:$0xf]  ;;  %v1806_v58 = vld [vmem:[#allocation4 + $0xd4] sm:$0xf0]  ;;  %v1481_v60 = vor.u32 %v1807_v52, %v1478_v53  ;;  %v1789_v61 = vld [vmem:[#allocation4 + $0x54] sm:$0xf]  ;;  %v1405_v62 = vor.u32 %v1790_v56, %v1404_v55 }
  0x33   :  { %350 = vmatpush.bf16.msra.mxu2 %v1261_v19  ;;  %v1406_v63 = vld [vmem:[#allocation4 + $0x58] sm:$0xf0]  ;;  %v1805_v0 = vld [vmem:[#allocation4 + $0xd4] sm:$0xf]  ;;  %v1469_v2 = vor.u32 %v1806_v58, %v1468_v57  ;;  %v1396_v3 = vld [vmem:[#allocation4 + $0x40] sm:$0xf] }
  0x34   :  { %v1470_v1 = vld [vmem:[#allocation4 + $0xd8] sm:$0xf0]  ;;  %v1788_v4 = vld [vmem:[#allocation4 + $0x44] sm:$0xf0]  ;;  %v1460_v5 = vld [vmem:[#allocation4 + $0xc0] sm:$0xf]  ;;  %v1409_v7 = vor.u32 %v1789_v61, %v1406_v63 }
  0x35   :  { %364 = vmatpush.bf16.msra.mxu3 %v1265_v26  ;;  %323 = vmatpush.bf16.msra.mxu0 %v1237_v30  ;;  %v1804_v6 = vld [vmem:[#allocation4 + $0xc4] sm:$0xf0]  ;;  %v1473_v8 = vor.u32 %v1805_v0, %v1470_v1  ;;  %v1787_v9 = vld [vmem:[#allocation4 + $0x44] sm:$0xf]  ;;  %v1397_v10 = vor.u32 %v1788_v4, %v1396_v3  ;;  %v1398_v11 = vld [vmem:[#allocation4 + $0x48] sm:$0xf0] }
  0x36   :  { %337 = vmatpush.bf16.msra.mxu1 %v1241_v33  ;;  %v1803_v12 = vld [vmem:[#allocation4 + $0xc4] sm:$0xf]  ;;  %v1462_v13 = vld [vmem:[#allocation4 + $0xc8] sm:$0xf0]  ;;  %v1461_v14 = vor.u32 %v1804_v6, %v1460_v5  ;;  %v1388_v15 = vld [vmem:[#allocation4 + $0x30] sm:$0xf]  ;;  %v1401_v19 = vor.u32 %v1787_v9, %v1398_v11 }
  0x37   :  { %351 = vmatpush.bf16.msra.mxu2 %v1245_v34  ;;  %v1786_v16 = vld [vmem:[#allocation4 + $0x34] sm:$0xf0]  ;;  %v1452_v17 = vld [vmem:[#allocation4 + $0xb0] sm:$0xf]  ;;  %v1465_v20 = vor.u32 %v1803_v12, %v1462_v13  ;;  %v1785_v21 = vld [vmem:[#allocation4 + $0x34] sm:$0xf] }
  0x38   :  { %324 = vmatmul.bf16.vlgmr.msra.gmra.mxu0 %v1746_v41  ;;  %v1802_v18 = vld [vmem:[#allocation4 + $0xb4] sm:$0xf0]  ;;  %v1389_v22 = vor.u32 %v1786_v16, %v1388_v15  ;;  %v1390_v23 = vld [vmem:[#allocation4 + $0x38] sm:$0xf0]  ;;  %v1801_v24 = vld [vmem:[#allocation4 + $0xb4] sm:$0xf] }
  0x39   :  { %582 = vmatpush.bf16.msrb.mxu0 %v1421_v36  ;;  %365 = vmatpush.bf16.msra.mxu3 %v1249_v42  ;;  %v1454_v25 = vld [vmem:[#allocation4 + $0xb8] sm:$0xf0]  ;;  %v1453_v26 = vor.u32 %v1802_v18, %v1452_v17  ;;  %v1380_v27 = vld [vmem:[#allocation4 + $0x20] sm:$0xf]  ;;  %v1784_v28 = vld [vmem:[#allocation4 + $0x24] sm:$0xf0]  ;;  %v1393_v31 = vor.u32 %v1785_v21, %v1390_v23 }
  0x3a   :  { %596 = vmatpush.bf16.msrb.mxu1 %v1485_v37  ;;  %352 = vmatmul.bf16.vlgmr.msra.gmra.mxu2 %v1746_v41  ;;  %v1444_v29 = vld [vmem:[#allocation4 + $0xa0] sm:$0xf]  ;;  %v1800_v30 = vld [vmem:[#allocation4 + $0xa4] sm:$0xf0]  ;;  %v1457_v32 = vor.u32 %v1801_v24, %v1454_v25  ;;  %v1783_v33 = vld [vmem:[#allocation4 + $0x24] sm:$0xf]  ;;  %v1381_v34 = vor.u32 %v1784_v28, %v1380_v27 }
  0x3b   :  { %338 = vmatmul.bf16.vlgmr.msra.gmra.mxu1 %v1746_v41  ;;  %610 = vmatpush.bf16.msrb.mxu2 %v1425_v47  ;;  %v1382_v35 = vld [vmem:[#allocation4 + $0x28] sm:$0xf0]  ;;  %v1799_v36 = vld [vmem:[#allocation4 + $0xa4] sm:$0xf]  ;;  %v1445_v38 = vor.u32 %v1800_v30, %v1444_v29  ;;  %v1372_v39 = vld [vmem:[#allocation4 + $0x10] sm:$0xf] }
  0x3c   :  { %366 = vmatmul.bf16.vlgmr.msra.gmra.mxu3 %v1746_v41  ;;  %v1446_v37 = vld [vmem:[#allocation4 + $0xa8] sm:$0xf0]  ;;  %v1782_v40 = vld [vmem:[#allocation4 + $0x14] sm:$0xf0]  ;;  %v1436_v41 = vld [vmem:[#allocation4 + $0x90] sm:$0xf]  ;;  %v1385_v43 = vor.u32 %v1783_v33, %v1382_v35 }
  0x3d   :  { %624 = vmatpush.bf16.msrb.mxu3 %v1489_v48  ;;  %583 = vmatpush.bf16.msrb.mxu0 %v1413_v50  ;;  %v1798_v42 = vld [vmem:[#allocation4 + $0x94] sm:$0xf0]  ;;  %v1449_v44 = vor.u32 %v1799_v36, %v1446_v37  ;;  %v1781_v45 = vld [vmem:[#allocation4 + $0x14] sm:$0xf]  ;;  %v1373_v46 = vor.u32 %v1782_v40, %v1372_v39  ;;  %v1374_v47 = vld [vmem:[#allocation4 + $0x18] sm:$0xf0] }
  0x3e   :  { %597 = vmatpush.bf16.msrb.mxu1 %v1477_v54  ;;  %v1797_v48 = vld [vmem:[#allocation4 + $0x94] sm:$0xf]  ;;  %v1438_v49 = vld [vmem:[#allocation4 + $0x98] sm:$0xf0]  ;;  %v1437_v50 = vor.u32 %v1798_v42, %v1436_v41  ;;  %v1364_v51 = vld [vmem:[#allocation4] sm:$0xf]  ;;  %v1377_v55 = vor.u32 %v1781_v45, %v1374_v47 }
  0x3f   :  { %611 = vmatpush.bf16.msrb.mxu2 %v1417_v59  ;;  %v1780_v52 = vld [vmem:[#allocation4 + $0x4] sm:$0xf0]  ;;  %v1428_v53 = vld [vmem:[#allocation4 + $0x80] sm:$0xf]  ;;  %v1441_v56 = vor.u32 %v1797_v48, %v1438_v49  ;;  %v1779_v57 = vld [vmem:[#allocation4 + $0x4] sm:$0xf] }
  0x40   :  { %v1796_v54 = vld [vmem:[#allocation4 + $0x84] sm:$0xf0]  ;;  %v1365_v58 = vor.u32 %v1780_v52, %v1364_v51  ;;  %v1366_v59 = vld [vmem:[#allocation4 + $0x8] sm:$0xf0]  ;;  %v1548_v1 = vld [vmem:[#allocation6 + $0x70] sm:$0xf] }
  0x41   :  { %625 = vmatpush.bf16.msrb.mxu3 %v1481_v60  ;;  %584 = vmatpush.bf16.msrb.mxu0 %v1405_v62  ;;  %v1795_v60 = vld [vmem:[#allocation4 + $0x84] sm:$0xf]  ;;  %v1430_v61 = vld [vmem:[#allocation4 + $0x88] sm:$0xf0]  ;;  %v1429_v62 = vor.u32 %v1796_v54, %v1428_v53  ;;  %v1369_v63 = vor.u32 %v1779_v57, %v1366_v59  ;;  %v1612_v3 = vld [vmem:[#allocation6 + $0xf0] sm:$0xf] }
  0x42   :  { %598 = vmatpush.bf16.msrb.mxu1 %v1469_v2  ;;  %v1433_v0 = vor.u32 %v1795_v60, %v1430_v61  ;;  %v1826_v2 = vld [vmem:[#allocation6 + $0x74] sm:$0xf0]  ;;  %v1825_v6 = vld [vmem:[#allocation6 + $0x74] sm:$0xf]  ;;  %v1614_v11 = vld [vmem:[#allocation6 + $0xf8] sm:$0xf0] }
  0x43   :  { %612 = vmatpush.bf16.msrb.mxu2 %v1409_v7  ;;  %v1549_v4 = vor.u32 %v1826_v2, %v1548_v1  ;;  %v1842_v5 = vld [vmem:[#allocation6 + $0xf4] sm:$0xf0]  ;;  %v1550_v7 = vld [vmem:[#allocation6 + $0x78] sm:$0xf0]  ;;  %v1540_v13 = vld [vmem:[#allocation6 + $0x60] sm:$0xf] }
  0x44   :  { %v1553_v9 = vor.u32 %v1825_v6, %v1550_v7  ;;  %v1604_v16 = vld [vmem:[#allocation6 + $0xe0] sm:$0xf]  ;;  %v1840_v17 = vld [vmem:[#allocation6 + $0xe4] sm:$0xf0]  ;;  %v1823_v18 = vld [vmem:[#allocation6 + $0x64] sm:$0xf] }
  0x45   :  { %626 = vmatpush.bf16.msrb.mxu3 %v1473_v8  ;;  %585 = vmatpush.bf16.msrb.mxu0 %v1397_v10  ;;  %v1613_v8 = vor.u32 %v1842_v5, %v1612_v3  ;;  %v1841_v10 = vld [vmem:[#allocation6 + $0xf4] sm:$0xf]  ;;  %v1839_v21 = vld [vmem:[#allocation6 + $0xe4] sm:$0xf]  ;;  %v1532_v25 = vld [vmem:[#allocation6 + $0x50] sm:$0xf] }
  0x46   :  { %599 = vmatpush.bf16.msrb.mxu1 %v1461_v14  ;;  %v1617_v12 = vor.u32 %v1841_v10, %v1614_v11  ;;  %v1824_v14 = vld [vmem:[#allocation6 + $0x64] sm:$0xf0]  ;;  %v1596_v27 = vld [vmem:[#allocation6 + $0xd0] sm:$0xf]  ;;  %v1838_v29 = vld [vmem:[#allocation6 + $0xd4] sm:$0xf0] }
  0x47   :  { %613 = vmatpush.bf16.msrb.mxu2 %v1401_v19  ;;  %v1541_v15 = vor.u32 %v1824_v14, %v1540_v13  ;;  %v1605_v19 = vor.u32 %v1840_v17, %v1604_v16  ;;  %v1821_v30 = vld [vmem:[#allocation6 + $0x54] sm:$0xf]  ;;  %v1598_v35 = vld [vmem:[#allocation6 + $0xd8] sm:$0xf0]  ;;  %v1524_v37 = vld [vmem:[#allocation6 + $0x40] sm:$0xf] }
  0x48   :  { %v1588_v39 = vld [vmem:[#allocation6 + $0xc0] sm:$0xf]  ;;  %v1836_v41 = vld [vmem:[#allocation6 + $0xc4] sm:$0xf0]  ;;  %v1819_v42 = vld [vmem:[#allocation6 + $0x44] sm:$0xf] }
  0x49   :  { %627 = vmatpush.bf16.msrb.mxu3 %v1465_v20  ;;  %586 = vmatpush.bf16.msrb.mxu0 %v1389_v22  ;;  %v1542_v20 = vld [vmem:[#allocation6 + $0x68] sm:$0xf0]  ;;  %v1516_v49 = vld [vmem:[#allocation6 + $0x30] sm:$0xf]  ;;  %v1834_v53 = vld [vmem:[#allocation6 + $0xb4] sm:$0xf0] }
  0x4a   :  { %600 = vmatpush.bf16.msrb.mxu1 %v1453_v26  ;;  %v1606_v22 = vld [vmem:[#allocation6 + $0xe8] sm:$0xf0]  ;;  %v1545_v23 = vor.u32 %v1823_v18, %v1542_v20  ;;  %v1822_v26 = vld [vmem:[#allocation6 + $0x54] sm:$0xf0]  ;;  %v1580_v52 = vld [vmem:[#allocation6 + $0xb0] sm:$0xf] }
  0x4b   :  { %614 = vmatpush.bf16.msrb.mxu2 %v1393_v31  ;;  %v1609_v24 = vor.u32 %v1839_v21, %v1606_v22  ;;  %v1533_v28 = vor.u32 %v1822_v26, %v1532_v25  ;;  %v1534_v31 = vld [vmem:[#allocation6 + $0x58] sm:$0xf0]  ;;  %v1590_v47 = vld [vmem:[#allocation6 + $0xc8] sm:$0xf0]  ;;  %v1817_v54 = vld [vmem:[#allocation6 + $0x34] sm:$0xf] }
  0x4c   :  { %v1537_v33 = vor.u32 %v1821_v30, %v1534_v31  ;;  %v1833_v57 = vld [vmem:[#allocation6 + $0xb4] sm:$0xf]  ;;  %v1508_v61 = vld [vmem:[#allocation6 + $0x20] sm:$0xf]  ;;  %v1832_v1 = vld [vmem:[#allocation6 + $0xa4] sm:$0xf0] }
  0x4d   :  { %628 = vmatpush.bf16.msrb.mxu3 %v1457_v32  ;;  %587 = vmatpush.bf16.msrb.mxu0 %v1381_v34  ;;  %v1597_v32 = vor.u32 %v1838_v29, %v1596_v27  ;;  %v1837_v34 = vld [vmem:[#allocation6 + $0xd4] sm:$0xf]  ;;  %v1815_v2 = vld [vmem:[#allocation6 + $0x24] sm:$0xf]  ;;  %v1510_v3 = vld [vmem:[#allocation6 + $0x28] sm:$0xf0] }
  0x4e   :  { %601 = vmatpush.bf16.msrb.mxu1 %v1445_v38  ;;  %v1601_v36 = vor.u32 %v1837_v34, %v1598_v35  ;;  %v1820_v38 = vld [vmem:[#allocation6 + $0x44] sm:$0xf0]  ;;  %v1513_v5 = vor.u32 %v1815_v2, %v1510_v3  ;;  %v1831_v6 = vld [vmem:[#allocation6 + $0xa4] sm:$0xf]  ;;  %v1574_v7 = vld [vmem:[#allocation6 + $0xa8] sm:$0xf0] }
  0x4f   :  { %615 = vmatpush.bf16.msrb.mxu2 %v1385_v43  ;;  %v1525_v40 = vor.u32 %v1820_v38, %v1524_v37  ;;  %v1526_v43 = vld [vmem:[#allocation6 + $0x48] sm:$0xf0]  ;;  %v1814_v10 = vld [vmem:[#allocation6 + $0x14] sm:$0xf0]  ;;  %v1564_v11 = vld [vmem:[#allocation6 + $0x90] sm:$0xf] }
  0x50   :  { %v1529_v45 = vor.u32 %v1819_v42, %v1526_v43  ;;  %v1830_v13 = vld [vmem:[#allocation6 + $0x94] sm:$0xf0]  ;;  %v1813_v14 = vld [vmem:[#allocation6 + $0x14] sm:$0xf]  ;;  %v1492_v20 = vld [vmem:[#allocation6] sm:$0xf] }
  0x51   :  { %629 = vmatpush.bf16.msrb.mxu3 %v1449_v44  ;;  %588 = vmatpush.bf16.msrb.mxu0 %v1373_v46  ;;  %v1589_v44 = vor.u32 %v1836_v41, %v1588_v39  ;;  %v1835_v46 = vld [vmem:[#allocation6 + $0xc4] sm:$0xf]  ;;  %v1565_v16 = vor.u32 %v1830_v13, %v1564_v11  ;;  %v1829_v18 = vld [vmem:[#allocation6 + $0x94] sm:$0xf]  ;;  %v1812_v22 = vld [vmem:[#allocation6 + $0x4] sm:$0xf0] }
  0x52   :  { %602 = vmatpush.bf16.msrb.mxu1 %v1437_v50  ;;  %v1593_v48 = vor.u32 %v1835_v46, %v1590_v47  ;;  %v1818_v50 = vld [vmem:[#allocation6 + $0x34] sm:$0xf0]  ;;  %v1493_v25 = vor.u32 %v1812_v22, %v1492_v20  ;;  %v1811_v27 = vld [vmem:[#allocation6 + $0x4] sm:$0xf]  ;;  %v1558_v31 = vld [vmem:[#allocation6 + $0x88] sm:$0xf0] }
  0x53   :  { %616 = vmatpush.bf16.msrb.mxu2 %v1377_v55  ;;  %v1517_v51 = vor.u32 %v1818_v50, %v1516_v49  ;;  %v1581_v55 = vor.u32 %v1834_v53, %v1580_v52  ;;  %v1827_v29 = vld [vmem:[#allocation6 + $0x84] sm:$0xf]  ;;  %v1858_v52 = vld [vmem:[%s2392_s7 + $0x78] sm:$0xff]  ;;  %v1847_v3 = vld [vmem:[%s2392_s7 + $0x20] sm:$0xff] }
  0x54   :  { %v1855_v11 = vld [vmem:[%s2392_s7 + $0x60] sm:$0xff]  ;;  %v1865_v13 = vld [vmem:[%s2392_s7 + $0xb0] sm:$0xff]  ;;  %v1852_v22 = vld [vmem:[%s2392_s7 + $0x48] sm:$0xff] }
  0x55   :  { %630 = vmatpush.bf16.msrb.mxu3 %v1441_v56  ;;  %589 = vmatpush.bf16.msrb.mxu0 %v1365_v58  ;;  %v1518_v56 = vld [vmem:[#allocation6 + $0x38] sm:$0xf0] }
  0x56   :  { %603 = vmatpush.bf16.msrb.mxu1 %v1429_v62  ;;  %v1582_v58 = vld [vmem:[#allocation6 + $0xb8] sm:$0xf0]  ;;  %v1521_v59 = vor.u32 %v1817_v54, %v1518_v56  ;;  %v1816_v62 = vld [vmem:[#allocation6 + $0x24] sm:$0xf0] }
  0x57   :  { %617 = vmatpush.bf16.msrb.mxu2 %v1369_v63  ;;  %v1585_v60 = vor.u32 %v1833_v57, %v1582_v58  ;;  %v1572_v63 = vld [vmem:[#allocation6 + $0xa0] sm:$0xf]  ;;  %v1857_v56 = vld [vmem:[%s2392_s7 + $0x70] sm:$0xff]  ;;  %v1843_v20 = vld [vmem:[%s2392_s7] sm:$0xff] }
  0x59   :  { %631 = vmatpush.bf16.msrb.mxu3 %v1433_v0  ;;  %840 = vmatpush.bf16.msra.mxu0 %v1549_v4  ;;  %v1509_v0 = vor.u32 %v1816_v62, %v1508_v61  ;;  %v1573_v4 = vor.u32 %v1832_v1, %v1572_v63  ;;  %v1848_v62 = vld [vmem:[%s2392_s7 + $0x28] sm:$0xff] }
  0x5a   :  { %854 = vmatpush.bf16.msra.mxu1 %v1613_v8  ;;  %v1577_v8 = vor.u32 %v1831_v6, %v1574_v7 }
  0x5b   :  { %868 = vmatpush.bf16.msra.mxu2 %v1553_v9  ;;  %v1500_v9 = vld [vmem:[#allocation6 + $0x10] sm:$0xf] }
  0x5d   :  { %882 = vmatpush.bf16.msra.mxu3 %v1617_v12  ;;  %841 = vmatpush.bf16.msra.mxu0 %v1541_v15  ;;  %v1501_v12 = vor.u32 %v1814_v10, %v1500_v9  ;;  %v1502_v15 = vld [vmem:[#allocation6 + $0x18] sm:$0xf0]  ;;  %v1846_v9 = vld [vmem:[%s2392_s7 + $0x18] sm:$0xff] }
  0x5e   :  { %855 = vmatpush.bf16.msra.mxu1 %v1605_v19  ;;  %v1505_v17 = vor.u32 %v1813_v14, %v1502_v15  ;;  %v1566_v19 = vld [vmem:[#allocation6 + $0x98] sm:$0xf0]  ;;  %v1866_v10 = vld [vmem:[%s2392_s7 + $0xb8] sm:$0xff] }
  0x5f   :  { %869 = vmatpush.bf16.msra.mxu2 %v1545_v23  ;;  %v1569_v21 = vor.u32 %v1829_v18, %v1566_v19  ;;  %v1556_v23 = vld [vmem:[#allocation6 + $0x80] sm:$0xf]  ;;  %v1854_v14 = vld [vmem:[%s2392_s7 + $0x58] sm:$0xff]  ;;  %v1853_v18 = vld [vmem:[%s2392_s7 + $0x50] sm:$0xff] }
  0x60   :  { %v1874_v15 = vld [vmem:[%s2392_s7 + $0xf8] sm:$0xff]  ;;  %v1873_v19 = vld [vmem:[%s2392_s7 + $0xf0] sm:$0xff] }
  0x61   :  { %883 = vmatpush.bf16.msra.mxu3 %v1609_v24  ;;  %842 = vmatpush.bf16.msra.mxu0 %v1533_v28  ;;  %v1828_v24 = vld [vmem:[#allocation6 + $0x84] sm:$0xf0]  ;;  %v1494_v28 = vld [vmem:[#allocation6 + $0x8] sm:$0xf0] }
  0x62   :  { %856 = vmatpush.bf16.msra.mxu1 %v1597_v32  ;;  %v1557_v26 = vor.u32 %v1828_v24, %v1556_v23  ;;  %v1497_v30 = vor.u32 %v1811_v27, %v1494_v28  ;;  %v1561_v32 = vor.u32 %v1827_v29, %v1558_v31  ;;  %v1872_v23 = vld [vmem:[%s2392_s7 + $0xe8] sm:$0xff]  ;;  %v1862_v24 = vld [vmem:[%s2392_s7 + $0x98] sm:$0xff]  ;;  %v1861_v27 = vld [vmem:[%s2392_s7 + $0x90] sm:$0xff] }
  0x63   :  { %870 = vmatpush.bf16.msra.mxu2 %v1537_v33  ;;  %v140_v33 = vld [vmem:[%s2387_s2] sm:$0xf]  ;;  %v1870_v28 = vld [vmem:[%s2392_s7 + $0xd8] sm:$0xff]  ;;  %v1860_v29 = vld [vmem:[%s2392_s7 + $0x88] sm:$0xff] }
  0x64   :  { %v143_v37 = vperm.slane %v140_v33, 1  ;;  %v144_v54 = vperm.slane %v140_v33, 2  ;;  %v145_v57 = vperm.slane %v140_v33, 3  ;;  %v1859_v31 = vld [vmem:[%s2392_s7 + $0x80] sm:$0xff] }
  0x65   :  { %884 = vmatpush.bf16.msra.mxu3 %v1601_v36  ;;  %843 = vmatpush.bf16.msra.mxu0 %v1525_v40  ;;  %v142_v36 = vperm.slane %v140_v33, 0  ;;  %v1868_v33 = vld [vmem:[%s2392_s7 + $0xc8] sm:$0xff] }
  0x66   :  { %857 = vmatpush.bf16.msra.mxu1 %v1589_v44 }
  0x67   :  { %871 = vmatpush.bf16.msra.mxu2 %v1529_v45 }
  0x69   :  { %885 = vmatpush.bf16.msra.mxu3 %v1593_v48  ;;  %844 = vmatpush.bf16.msra.mxu0 %v1517_v51  ;;  %v1850_v51 = vld [vmem:[%s2392_s7 + $0x38] sm:$0xff] }
  0x6a   :  { %858 = vmatpush.bf16.msra.mxu1 %v1581_v55  ;;  %v1849_v55 = vld [vmem:[%s2392_s7 + $0x30] sm:$0xff] }
  0x6b   :  { %872 = vmatpush.bf16.msra.mxu2 %v1521_v59 }
  0x6d   :  { %886 = vmatpush.bf16.msra.mxu3 %v1585_v60  ;;  %845 = vmatpush.bf16.msra.mxu0 %v1509_v0 }
  0x6e   :  { %859 = vmatpush.bf16.msra.mxu1 %v1573_v4 }
  0x6f   :  { %873 = vmatpush.bf16.msra.mxu2 %v1513_v5 }
  0x71   :  { %887 = vmatpush.bf16.msra.mxu3 %v1577_v8  ;;  %846 = vmatpush.bf16.msra.mxu0 %v1501_v12  ;;  %v1856_v8 = vld [vmem:[%s2392_s7 + $0x68] sm:$0xff]  ;;  %v1845_v12 = vld [vmem:[%s2392_s7 + $0x10] sm:$0xff] }
  0x72   :  { %860 = vmatpush.bf16.msra.mxu1 %v1565_v16  ;;  %v1844_v16 = vld [vmem:[%s2392_s7 + $0x8] sm:$0xff] }
  0x73   :  { %874 = vmatpush.bf16.msra.mxu2 %v1505_v17  ;;  %v1864_v17 = vld [vmem:[%s2392_s7 + $0xa8] sm:$0xff] }
  0x75   :  { %888 = vmatpush.bf16.msra.mxu3 %v1569_v21  ;;  %847 = vmatpush.bf16.msra.mxu0 %v1493_v25  ;;  %v1863_v21 = vld [vmem:[%s2392_s7 + $0xa0] sm:$0xff] }
  0x76   :  { %861 = vmatpush.bf16.msra.mxu1 %v1557_v26  ;;  %v1851_v25 = vld [vmem:[%s2392_s7 + $0x40] sm:$0xff] }
  0x77   :  { %875 = vmatpush.bf16.msra.mxu2 %v1497_v30  ;;  %v1871_v26 = vld [vmem:[%s2392_s7 + $0xe0] sm:$0xff]  ;;  %v1869_v30 = vld [vmem:[%s2392_s7 + $0xd0] sm:$0xff] }
  0x79   :  { %889 = vmatpush.bf16.msra.mxu3 %v1561_v32  ;;  %v416_v32 = vld [vmem:[%s2389_s4] sm:$0x3] }
  0xb5   :  { %v325_v34 = vpop.f32.mrf.mxu0 }
  0xb6   :  { %v326_v38 = vadd.f32 %v325_v34, %v142_v36 }
  0xb8   :  { %v339_v35 = vpop.f32.mrf.mxu1  ;;  %v372_v46 = vmax.f32 %v326_v38, 0.0 }
  0xb9   :  { %v340_v39 = vadd.f32 %v339_v35, %v143_v37  ;;  %v418_v35 = vperm.slane %v416_v32, 0 }
  0xbb   :  { %v373_v48 = vmax.f32 %v340_v39, 0.0 }
  0xbd   :  { %v327_v40 = vpop.f32.mrf.mxu0  ;;  %v353_v41 = vpop.f32.mrf.mxu2 }
  0xbe   :  { %v328_v42 = vadd.f32 %v327_v40, %v142_v36  ;;  %v354_v60 = vadd.f32 %v353_v41, %v144_v54  ;;  %v419_v40 = vperm.slane %v416_v32, 1 }
  0xbf   :  { %v367_v44 = vpop.f32.mrf.mxu3 }
  0xc0   :  { %v341_v43 = vpop.f32.mrf.mxu1  ;;  %v376_v47 = vmax.f32 %v328_v42, 0.0  ;;  %v368_v63 = vadd.f32 %v367_v44, %v145_v57  ;;  %v374_v1 = vmax.f32 %v354_v60, 0.0 }
  0xc1   :  { %v342_v45 = vadd.f32 %v341_v43, %v143_v37  ;;  %v1867_v37 = vld [vmem:[%s2392_s7 + $0xc0] sm:$0xff] }
  0xc2   :  { %v380_v50 = vpack.c.bf16 %v376_v47, %v372_v46  ;;  %v375_v4 = vmax.f32 %v368_v63, 0.0 }
  0xc3   :  { %v377_v49 = vmax.f32 %v342_v45, 0.0 }
  0xc4   :  { %590 = vmatmul.bf16.vlgmr.msrb.gmra.mxu0 %v380_v50  ;;  %618 = vmatmul.bf16.vlgmr.msrb.gmra.mxu2 %v380_v50 }
  0xc5   :  { %v381_v53 = vpack.c.bf16 %v377_v49, %v373_v48  ;;  %1164 = vmatpush.bf16.msrb.mxu0 %v1850_v51  ;;  %v355_v58 = vpop.f32.mrf.mxu2  ;;  %1192 = vmatpush.bf16.msrb.mxu2 %v1866_v10  ;;  %v674_v51 = vld [vmem:[#allocation7] sm:$0x3] }
  0xc6   :  { %v356_v61 = vadd.f32 %v355_v58, %v144_v54  ;;  %v676_v58 = vperm.slane %v674_v51, 0 }
  0xc7   :  { %604 = vmatmul.bf16.vlgmr.msrb.gmra.mxu1 %v381_v53  ;;  %632 = vmatmul.bf16.vlgmr.msrb.gmra.mxu3 %v381_v53  ;;  %v369_v59 = vpop.f32.mrf.mxu3 }
  0xc8   :  { %1178 = vmatpush.bf16.msrb.mxu1 %v1858_v52  ;;  %v370_v0 = vadd.f32 %v369_v59, %v145_v57  ;;  %v378_v2 = vmax.f32 %v356_v61, 0.0  ;;  %1206 = vmatpush.bf16.msrb.mxu3 %v1874_v15 }
  0xc9   :  { %1165 = vmatpush.bf16.msrb.mxu0 %v1849_v55  ;;  %1193 = vmatpush.bf16.msrb.mxu2 %v1865_v13 }
  0xca   :  { %v379_v5 = vmax.f32 %v370_v0, 0.0  ;;  %v382_v6 = vpack.c.bf16 %v378_v2, %v374_v1  ;;  %v677_v1 = vperm.slane %v674_v51, 1 }
  0xcc   :  { %1179 = vmatpush.bf16.msrb.mxu1 %v1857_v56  ;;  %v383_v7 = vpack.c.bf16 %v379_v5, %v375_v4  ;;  %1207 = vmatpush.bf16.msrb.mxu3 %v1873_v19 }
  0xcd   :  { %1166 = vmatpush.bf16.msrb.mxu0 %v1848_v62  ;;  %1194 = vmatpush.bf16.msrb.mxu2 %v1864_v17 }
  0xd0   :  { %1180 = vmatpush.bf16.msrb.mxu1 %v1856_v8  ;;  %1208 = vmatpush.bf16.msrb.mxu3 %v1872_v23 }
  0xd1   :  { %1167 = vmatpush.bf16.msrb.mxu0 %v1847_v3  ;;  %1195 = vmatpush.bf16.msrb.mxu2 %v1863_v21  ;;  %v1884_v21 = vld [vmem:[#allocation9] ss:$0 sm:$0xff] }
  0xd4   :  { %848 = vmatmul.bf16.vlgmr.msra.gmra.mxu0 %v382_v6  ;;  %876 = vmatmul.bf16.vlgmr.msra.gmra.mxu2 %v382_v6 }
  0xd5   :  { %1168 = vmatpush.bf16.msrb.mxu0 %v1846_v9  ;;  %1181 = vmatpush.bf16.msrb.mxu1 %v1855_v11 }
  0xd6   :  { %1196 = vmatpush.bf16.msrb.mxu2 %v1862_v24  ;;  %1209 = vmatpush.bf16.msrb.mxu3 %v1871_v26 }
  0xd7   :  { %862 = vmatmul.bf16.vlgmr.msra.gmra.mxu1 %v383_v7  ;;  %890 = vmatmul.bf16.vlgmr.msra.gmra.mxu3 %v383_v7 }
  0xd9   :  { %1169 = vmatpush.bf16.msrb.mxu0 %v1845_v12  ;;  %1182 = vmatpush.bf16.msrb.mxu1 %v1854_v14 }
  0xda   :  { %1197 = vmatpush.bf16.msrb.mxu2 %v1861_v27  ;;  %1210 = vmatpush.bf16.msrb.mxu3 %v1870_v28 }
  0xdd   :  { %1170 = vmatpush.bf16.msrb.mxu0 %v1844_v16  ;;  %1183 = vmatpush.bf16.msrb.mxu1 %v1853_v18 }
  0xde   :  { %1198 = vmatpush.bf16.msrb.mxu2 %v1860_v29  ;;  %1211 = vmatpush.bf16.msrb.mxu3 %v1869_v30 }
  0xe1   :  { %1171 = vmatpush.bf16.msrb.mxu0 %v1843_v20  ;;  %1184 = vmatpush.bf16.msrb.mxu1 %v1852_v22 }
  0xe2   :  { %1199 = vmatpush.bf16.msrb.mxu2 %v1859_v31  ;;  %1212 = vmatpush.bf16.msrb.mxu3 %v1868_v33 }
  0xe5   :  { %1185 = vmatpush.bf16.msrb.mxu1 %v1851_v25 }
  0xe6   :  { %1213 = vmatpush.bf16.msrb.mxu3 %v1867_v37 }
 0x141   :  { %v591_v34 = vpop.f32.mrf.mxu0 }
 0x142   :  { %v592_v38 = vadd.f32 %v591_v34, %v418_v35 }
 0x144   :  { %v605_v36 = vpop.f32.mrf.mxu1 }
 0x145   :  { %v606_v43 = vadd.f32 %v605_v36, %v592_v38 }
 0x147   :  { %v619_v39 = vpop.f32.mrf.mxu2  ;;  %v638_v48 = vmax.f32 %v606_v43, 0.0 }
 0x148   :  { %v620_v46 = vadd.f32 %v619_v39, %v419_v40 }
 0x149   :  { %v593_v42 = vpop.f32.mrf.mxu0 }
 0x14a   :  { %v633_v41 = vpop.f32.mrf.mxu3  ;;  %v594_v44 = vadd.f32 %v593_v42, %v418_v35 }
 0x14b   :  { %v634_v52 = vadd.f32 %v633_v41, %v620_v46 }
 0x14c   :  { %v607_v45 = vpop.f32.mrf.mxu1 }
 0x14d   :  { %v608_v47 = vadd.f32 %v607_v45, %v594_v44  ;;  %v639_v60 = vmax.f32 %v634_v52, 0.0 }
 0x14f   :  { %v640_v49 = vmax.f32 %v608_v47, 0.0  ;;  %v621_v50 = vpop.f32.mrf.mxu2 }
 0x150   :  { %v622_v54 = vadd.f32 %v621_v50, %v419_v40 }
 0x151   :  { %v900_v53 = vpack.c.bf16 %v640_v49, %v638_v48  ;;  %v849_v56 = vpop.f32.mrf.mxu0 }
 0x152   :  { %v635_v55 = vpop.f32.mrf.mxu3  ;;  %v850_v63 = vadd.f32 %v849_v56, %v676_v58 }
 0x153   :  { %v636_v57 = vadd.f32 %v635_v55, %v622_v54  ;;  %1172 = vmatmul.bf16.vlgmr.msrb.gmra.mxu0 %v900_v53 }
 0x154   :  { %v863_v59 = vpop.f32.mrf.mxu1 }
 0x155   :  { %v641_v61 = vmax.f32 %v636_v57, 0.0  ;;  %v864_v4 = vadd.f32 %v863_v59, %v850_v63 }
 0x157   :  { %v901_v62 = vpack.c.bf16 %v641_v61, %v639_v60  ;;  %v877_v0 = vpop.f32.mrf.mxu2  ;;  %v896_v9 = vmax.f32 %v864_v4, 0.0 }
 0x158   :  { %v878_v7 = vadd.f32 %v877_v0, %v677_v1 }
 0x159   :  { %1186 = vmatmul.bf16.vlgmr.msrb.gmra.mxu1 %v901_v62  ;;  %v851_v3 = vpop.f32.mrf.mxu0 }
 0x15a   :  { %v891_v2 = vpop.f32.mrf.mxu3  ;;  %v852_v5 = vadd.f32 %v851_v3, %v676_v58 }
 0x15b   :  { %v892_v12 = vadd.f32 %v891_v2, %v878_v7 }
 0x15c   :  { %v865_v6 = vpop.f32.mrf.mxu1 }
 0x15d   :  { %v866_v8 = vadd.f32 %v865_v6, %v852_v5  ;;  %v897_v17 = vmax.f32 %v892_v12, 0.0 }
 0x15f   :  { %v898_v10 = vmax.f32 %v866_v8, 0.0  ;;  %v879_v11 = vpop.f32.mrf.mxu2 }
 0x160   :  { %v880_v14 = vadd.f32 %v879_v11, %v677_v1 }
 0x161   :  { %v902_v13 = vpack.c.bf16 %v898_v10, %v896_v9 }
 0x162   :  { %v893_v15 = vpop.f32.mrf.mxu3 }
 0x163   :  { %v894_v16 = vadd.f32 %v893_v15, %v880_v14  ;;  %1200 = vmatmul.bf16.vlgmr.msrb.gmra.mxu2 %v902_v13 }
 0x165   :  { %v899_v18 = vmax.f32 %v894_v16, 0.0 }
 0x167   :  { %v903_v19 = vpack.c.bf16 %v899_v18, %v897_v17 }
 0x169   :  { %1214 = vmatmul.bf16.vlgmr.msrb.gmra.mxu3 %v903_v19 }
 0x1d0   :  { %v1173_v20 = vpop.f32.mrf.mxu0 }
 0x1d1   :  { %v1174_v24 = vadd.f32 %v1884_v21, %v1173_v20 }
 0x1d6   :  { %v1187_v22 = vpop.f32.mrf.mxu1 }
 0x1d7   :  { %v1188_v25 = vadd.f32 %v1187_v22, %v1174_v24 }
 0x1d8   :  { %v1175_v27 = vpop.f32.mrf.mxu0 }
 0x1d9   :  { %v1176_v31 = vadd.f32 %v1884_v21, %v1175_v27 }
 0x1de   :  { %v1189_v30 = vpop.f32.mrf.mxu1 }
 0x1df   :  { %v1190_v33 = vadd.f32 %v1189_v30, %v1176_v31 }
 0x1e6   :  { %v1201_v23 = vpop.f32.mrf.mxu2 }
 0x1e7   :  { %v1202_v26 = vadd.f32 %v1201_v23, %v1188_v25 }
 0x1ec   :  { %v1215_v28 = vpop.f32.mrf.mxu3 }
 0x1ed   :  { %v1216_v29 = vadd.f32 %v1215_v28, %v1202_v26 }
 0x1ee   :  { %v1203_v32 = vpop.f32.mrf.mxu2 }
 0x1ef   :  { %1221 = vst.msk [vmem:[%s2394_s9] sm:$0xff] %vm1220_vm0, %v1216_v29  ;;  %v1204_v34 = vadd.f32 %v1203_v32, %v1190_v33 }
 0x1f4   :  { %v1217_v35 = vpop.f32.mrf.mxu3 }
 0x1f5   :  { %v1218_v36 = vadd.f32 %v1217_v35, %v1204_v34 }
 0x1f7   :  { %1222 = vst.msk [vmem:[%s2394_s9 + $0x8] sm:$0xff] %vm1220_vm0, %v1218_v36 }
 0x1f8   :  { %1227 = vsyncpa [#allocation3], 1 }
 0x1f9   :  { %1228 = vsyncpa [#allocation5], 1 }
 0x1fa   :  { %1229 = vsyncpa [#allocation8], 1 }

</bundles_post_ra>
